<compile_context>
chip_gen: v7x
topology: tpu7x:2x2x1
jax: 0.10.0
libtpu: 0.0.40
codegen_flags: <defaults>
</compile_context>

<pallas_src>
import functools

import jax
import jax.numpy as jnp
from jax.experimental import pallas as pl
from jax.experimental.pallas import tpu as pltpu


def _conv_basis_kernel(x_ref, wb_ref, wp_ref, bias_ref, o_ref, patch_ref, *,
                       K, Wp, CIN, NB, GROUP, NFEAT, MC, NCHUNK):
    """One grid step = one batch item, all groups, both convs fused.

    x_ref     : (GROUP, CIN, L)      flattened zero-padded input, flat-spatial on lanes
    wb_ref    : (NB, KKC)            basis weight, K*K taps fused on the contraction axis
    wp_ref    : (GROUP, NFEAT, NB)   1x1 projection weight, per group
    bias_ref  : (NFEAT, 1)           combined bias (basis bias already folded in)
    o_ref     : (NFEAT, MLEN)        lane-dense output, MLEN = MC * NCHUNK (% 128 == 0)
    patch_ref : (KKC, GROUP*MC)      im2col scratch for ONE spatial chunk
    """
    # Static Python loop over spatial chunks: every lane slice below has a
    # static start, and chunk boundaries are multiples of 128.
    for ci in range(NCHUNK):
        cs = ci * MC

        # --- im2col: each tap is a static lane slice of the flat padded input.
        for g in range(GROUP):
            for ky in range(K):
                for kx in range(K):
                    t = ky * K + kx
                    off = cs + ky * Wp + kx
                    patch_ref[t * CIN:(t + 1) * CIN, g * MC:(g + 1) * MC] = (
                        x_ref[g, :, off:off + MC])

        # --- basis conv: ONE unbatched 2-D MXU contraction over K*K*CIN,
        # GROUP folded into the lane dimension; weight stays unbroadcast.
        y = jnp.dot(wb_ref[...], patch_ref[...],
                    preferred_element_type=jnp.float32)        # (NB, GROUP*MC)

        # --- fused 1x1 projection: accumulate per-group contributions from
        # 128-aligned lane slices of y (group-major order == torch.cat(dim=1)).
        z = jnp.dot(wp_ref[0], y[:, 0:MC], preferred_element_type=jnp.float32)
        for g in range(1, GROUP):
            z = z + jnp.dot(wp_ref[g], y[:, g * MC:(g + 1) * MC],
                            preferred_element_type=jnp.float32)

        o_ref[:, cs:cs + MC] = (z + bias_ref[...]).astype(o_ref.dtype)


def _round_up(a, b):
    return ((a + b - 1) // b) * b


def _vmem_budget_bytes():
    """0.75 * physical VMEM: ~96 MiB on v5e/v6e, ~48 MiB on v7x."""
    cap = 64 * 1024 * 1024
    try:
        info = pltpu.get_tpu_info()
        cap = int(getattr(info, "vmem_capacity_bytes", cap))
    except Exception:
        pass
    return (3 * cap) // 4


def conv_basis_forward(x, basis, basis_bias, proj_weight, proj_bias, *,
                       basis_size, n_basis, kernel_size):
    """x: (N, n_feat, H, W) f32 NCHW; returns (N, n_feat, H, W) (full forward)."""
    N, n_feat, H, W = x.shape
    group = n_feat // basis_size
    K = kernel_size
    pad = K // 2
    Wp = W + 2 * pad
    KKC = K * K * basis_size

    budget = _vmem_budget_bytes()

    # Spatial chunking: keep the im2col scratch (KKC x GROUP*MC f32) well under
    # the VMEM budget; all chunk sizes are multiples of 128 lanes.
    mlen128 = _round_up(H * Wp, 128)
    mc_cap = max(128, ((budget // 6) // (KKC * group * 4) // 128) * 128)
    nchunk = max(1, -(-mlen128 // mc_cap))
    MC = _round_up(-(-mlen128 // nchunk), 128)
    MLEN = MC * nchunk                       # total lane-dense flat output length

    # Flat padded input length: the last chunk's last tap must stay in bounds.
    L_need = MLEN + (K - 1) * (Wp + 1)
    Hp2 = -(-L_need // Wp)                   # rows of the zero-padded image
    L = Hp2 * Wp

    # ---- glue: ONE fused pad (no transposes, no second tail pad) ------------
    xg = x.reshape(N, group, basis_size, H, W)
    xp = jnp.pad(xg, ((0, 0), (0, 0), (0, 0),
                      (pad, Hp2 - H - pad), (pad, pad)))
    xf = xp.reshape(N, group, basis_size, L)

    # ---- weights: tiny resident operands -------------------------------------
    wbasis = jnp.transpose(basis, (0, 2, 3, 1)).reshape(n_basis, KKC)
    wproj_flat = proj_weight.reshape(n_feat, group * n_basis)
    wproj = wproj_flat.reshape(n_feat, group, n_basis).transpose(1, 0, 2)
    # Fold basis_bias through the (linear) projection: numerically identical,
    # removes the y-sized in-kernel bias add and one resident operand.
    bias_comb = (wproj_flat @ jnp.tile(basis_bias, group) + proj_bias
                 ).reshape(n_feat, 1).astype(jnp.float32)

    kern = functools.partial(_conv_basis_kernel, K=K, Wp=Wp, CIN=basis_size,
                             NB=n_basis, GROUP=group, NFEAT=n_feat, MC=MC,
                             NCHUNK=nchunk)

    flops = 2 * N * H * W * (group * n_basis * KKC + n_feat * group * n_basis)
    bytes_accessed = 4 * (xf.size + N * n_feat * MLEN
                          + wbasis.size + wproj.size + bias_comb.size)

    out_flat = pl.pallas_call(
        kern,
        out_shape=jax.ShapeDtypeStruct((N, n_feat, MLEN), jnp.float32),
        grid=(N,),
        in_specs=[
            pl.BlockSpec((None, group, basis_size, L), lambda n: (n, 0, 0, 0)),
            pl.BlockSpec((n_basis, KKC), lambda n: (0, 0)),
            pl.BlockSpec((group, n_feat, n_basis), lambda n: (0, 0, 0)),
            pl.BlockSpec((n_feat, 1), lambda n: (0, 0)),
        ],
        out_specs=pl.BlockSpec((None, n_feat, MLEN), lambda n: (n, 0, 0)),
        scratch_shapes=[pltpu.VMEM((KKC, group * MC), jnp.float32)],
        compiler_params=pltpu.CompilerParams(
            dimension_semantics=("parallel",),
            vmem_limit_bytes=budget),
        cost_estimate=pl.CostEstimate(flops=flops, transcendentals=0,
                                      bytes_accessed=bytes_accessed),
    )(xf, wbasis, wproj, bias_comb)

    # Drop the 128-alignment tail and the width-pad gap columns (one small
    # fused copy).
    out = out_flat[:, :, :H * Wp].reshape(N, n_feat, H, Wp)[:, :, :, :W]
    return out
    # TODO(synk): for very large H*W a single image's input/output block can
    # still exceed VMEM; add a row-block grid axis with a (K-1)-row halo (this
    # would also feed v7x's second TensorCore when N == 1) and write the
    # (H, W) output directly from the kernel to remove the final slice copy.


def _reference(x, basis, basis_bias, proj_weight, proj_bias, *,
               basis_size, n_basis, kernel_size):
    """Pure-JAX reference mirroring conv_basis.forward (multi/one group)."""
    N, n_feat, H, W = x.shape
    group = n_feat // basis_size
    pad = kernel_size // 2
    hp = jax.lax.Precision.HIGHEST
    ys = []
    for g in range(group):
        xi = x[:, g * basis_size:(g + 1) * basis_size]
        yi = jax.lax.conv_general_dilated(
            xi, basis, window_strides=(1, 1),
            padding=((pad, pad), (pad, pad)),
            dimension_numbers=("NCHW", "OIHW", "NCHW"), precision=hp)
        ys.append(yi + basis_bias.reshape(1, n_basis, 1, 1))
    y = jnp.concatenate(ys, axis=1)
    z = jax.lax.conv_general_dilated(
        y, proj_weight, window_strides=(1, 1), padding=((0, 0), (0, 0)),
        dimension_numbers=("NCHW", "OIHW", "NCHW"), precision=hp)
    return z + proj_bias.reshape(1, n_feat, 1, 1)


if __name__ == "__main__":
    # Small shapes consistent with the module (multi-group path: group = 2).
    n_feat = 8
    basis_size = 4
    n_basis = 8
    kernel_size = 3
    N, H, W = 2, 16, 16
    group = n_feat // basis_size

    key = jax.random.PRNGKey(0)
    kx_, kb_, kbb_, kpw_, kpb_ = jax.random.split(key, 5)
    x = jax.random.normal(kx_, (N, n_feat, H, W), dtype=jnp.float32)
    basis = jax.random.normal(
        kb_, (n_basis, basis_size, kernel_size, kernel_size), dtype=jnp.float32)
    basis_bias = 0.1 * jax.random.normal(kbb_, (n_basis,), dtype=jnp.float32)
    fan_in = n_basis * group
    bound = (6.0 / fan_in) ** 0.5   # kaiming_uniform-like init for proj_weight
    proj_weight = jax.random.uniform(
        kpw_, (n_feat, n_basis * group, 1, 1), dtype=jnp.float32,
        minval=-bound, maxval=bound)
    proj_bias = 0.05 * jax.random.normal(kpb_, (n_feat,), dtype=jnp.float32)

    y = conv_basis_forward(x, basis, basis_bias, proj_weight, proj_bias,
                           basis_size=basis_size, n_basis=n_basis,
                           kernel_size=kernel_size)
    y = jax.block_until_ready(y)

    y_ref = _reference(x, basis, basis_bias, proj_weight, proj_bias,
                       basis_size=basis_size, n_basis=n_basis,
                       kernel_size=kernel_size)
    assert y.shape == (N, n_feat, H, W)
    assert jnp.allclose(y, y_ref, atol=5e-2, rtol=1e-2), \
        float(jnp.max(jnp.abs(y - y_ref)))
    print("KERNEL_OK")
</pallas_src>

<mosaic_0001>
module attributes {stable_mosaic.version = 11 : i64} {
  func.func @_conv_basis_kernel(%arg0: i32, %arg1: memref<1x2x4x432xf32, #tpu.memory_space<vmem>>, %arg2: memref<8x36xf32, #tpu.memory_space<vmem>>, %arg3: memref<2x8x8xf32, #tpu.memory_space<vmem>>, %arg4: memref<8x1xf32, #tpu.memory_space<vmem>>, %arg5: memref<1x8x384xf32, #tpu.memory_space<vmem>>, %arg6: memref<36x768xf32, #tpu.memory_space<vmem>>) attributes {dimension_semantics = [#tpu.dimension_semantics<parallel>], iteration_bounds = array<i64: 2>, scalar_prefetch = 0 : i64, scratch_operands = 1 : i64, tpu.core_type = #tpu.core_type<tc>, window_params = [{transform_indices = @transform_0, window_bounds = array<i64: 1, 2, 4, 432>}, {pipeline_mode = #tpu.pipeline_mode<synchronous>, transform_indices = @transform_1, window_bounds = array<i64: 8, 36>}, {pipeline_mode = #tpu.pipeline_mode<synchronous>, transform_indices = @transform_2, window_bounds = array<i64: 2, 8, 8>}, {pipeline_mode = #tpu.pipeline_mode<synchronous>, transform_indices = @transform_3, window_bounds = array<i64: 8, 1>}, {transform_indices = @transform_4, window_bounds = array<i64: 1, 8, 384>}]} {
    %c0 = arith.constant 0 : index
    %c0_0 = arith.constant 0 : index
    %c0_1 = arith.constant 0 : index
    %c0_2 = arith.constant 0 : index
    %0 = vector.load %arg1[%c0, %c0_0, %c0_1, %c0_2] : memref<1x2x4x432xf32, #tpu.memory_space<vmem>>, vector<1x1x4x384xf32>
    %1 = vector.shape_cast %0 : vector<1x1x4x384xf32> to vector<4x384xf32>
    %c0_3 = arith.constant 0 : index
    %c0_4 = arith.constant 0 : index
    %2 = vector.load %arg6[%c0_3, %c0_4] : memref<36x768xf32, #tpu.memory_space<vmem>>, vector<4x384xf32>
    tpu.vector_store %arg6[%c0_3, %c0_4], %1 {strides = array<i32>} : memref<36x768xf32, #tpu.memory_space<vmem>>, vector<4x384xf32>,
    %c0_5 = arith.constant 0 : index
    %c0_6 = arith.constant 0 : index
    %c0_7 = arith.constant 0 : index
    %c1 = arith.constant 1 : index
    %3 = vector.load %arg1[%c0_5, %c0_6, %c0_7, %c1] : memref<1x2x4x432xf32, #tpu.memory_space<vmem>>, vector<1x1x4x384xf32>
    %4 = vector.shape_cast %3 : vector<1x1x4x384xf32> to vector<4x384xf32>
    %c4 = arith.constant 4 : index
    %c0_8 = arith.constant 0 : index
    %5 = vector.load %arg6[%c4, %c0_8] : memref<36x768xf32, #tpu.memory_space<vmem>>, vector<4x384xf32>
    tpu.vector_store %arg6[%c4, %c0_8], %4 {strides = array<i32>} : memref<36x768xf32, #tpu.memory_space<vmem>>, vector<4x384xf32>,
    %c0_9 = arith.constant 0 : index
    %c0_10 = arith.constant 0 : index
    %c0_11 = arith.constant 0 : index
    %c2 = arith.constant 2 : index
    %6 = vector.load %arg1[%c0_9, %c0_10, %c0_11, %c2] : memref<1x2x4x432xf32, #tpu.memory_space<vmem>>, vector<1x1x4x384xf32>
    %7 = vector.shape_cast %6 : vector<1x1x4x384xf32> to vector<4x384xf32>
    %c8 = arith.constant 8 : index
    %c0_12 = arith.constant 0 : index
    %8 = vector.load %arg6[%c8, %c0_12] : memref<36x768xf32, #tpu.memory_space<vmem>>, vector<4x384xf32>
    tpu.vector_store %arg6[%c8, %c0_12], %7 {strides = array<i32>} : memref<36x768xf32, #tpu.memory_space<vmem>>, vector<4x384xf32>,
    %c0_13 = arith.constant 0 : index
    %c0_14 = arith.constant 0 : index
    %c0_15 = arith.constant 0 : index
    %c18 = arith.constant 18 : index
    %9 = vector.load %arg1[%c0_13, %c0_14, %c0_15, %c18] : memref<1x2x4x432xf32, #tpu.memory_space<vmem>>, vector<1x1x4x384xf32>
    %10 = vector.shape_cast %9 : vector<1x1x4x384xf32> to vector<4x384xf32>
    %c12 = arith.constant 12 : index
    %c0_16 = arith.constant 0 : index
    %11 = vector.load %arg6[%c12, %c0_16] : memref<36x768xf32, #tpu.memory_space<vmem>>, vector<4x384xf32>
    tpu.vector_store %arg6[%c12, %c0_16], %10 {strides = array<i32>} : memref<36x768xf32, #tpu.memory_space<vmem>>, vector<4x384xf32>,
    %c0_17 = arith.constant 0 : index
    %c0_18 = arith.constant 0 : index
    %c0_19 = arith.constant 0 : index
    %c19 = arith.constant 19 : index
    %12 = vector.load %arg1[%c0_17, %c0_18, %c0_19, %c19] : memref<1x2x4x432xf32, #tpu.memory_space<vmem>>, vector<1x1x4x384xf32>
    %13 = vector.shape_cast %12 : vector<1x1x4x384xf32> to vector<4x384xf32>
    %c16 = arith.constant 16 : index
    %c0_20 = arith.constant 0 : index
    %14 = vector.load %arg6[%c16, %c0_20] : memref<36x768xf32, #tpu.memory_space<vmem>>, vector<4x384xf32>
    tpu.vector_store %arg6[%c16, %c0_20], %13 {strides = array<i32>} : memref<36x768xf32, #tpu.memory_space<vmem>>, vector<4x384xf32>,
    %c0_21 = arith.constant 0 : index
    %c0_22 = arith.constant 0 : index
    %c0_23 = arith.constant 0 : index
    %c20 = arith.constant 20 : index
    %15 = vector.load %arg1[%c0_21, %c0_22, %c0_23, %c20] : memref<1x2x4x432xf32, #tpu.memory_space<vmem>>, vector<1x1x4x384xf32>
    %16 = vector.shape_cast %15 : vector<1x1x4x384xf32> to vector<4x384xf32>
    %c20_24 = arith.constant 20 : index
    %c0_25 = arith.constant 0 : index
    %17 = vector.load %arg6[%c20_24, %c0_25] : memref<36x768xf32, #tpu.memory_space<vmem>>, vector<4x384xf32>
    tpu.vector_store %arg6[%c20_24, %c0_25], %16 {strides = array<i32>} : memref<36x768xf32, #tpu.memory_space<vmem>>, vector<4x384xf32>,
    %c0_26 = arith.constant 0 : index
    %c0_27 = arith.constant 0 : index
    %c0_28 = arith.constant 0 : index
    %c36 = arith.constant 36 : index
    %18 = vector.load %arg1[%c0_26, %c0_27, %c0_28, %c36] : memref<1x2x4x432xf32, #tpu.memory_space<vmem>>, vector<1x1x4x384xf32>
    %19 = vector.shape_cast %18 : vector<1x1x4x384xf32> to vector<4x384xf32>
    %c24 = arith.constant 24 : index
    %c0_29 = arith.constant 0 : index
    %20 = vector.load %arg6[%c24, %c0_29] : memref<36x768xf32, #tpu.memory_space<vmem>>, vector<4x384xf32>
    tpu.vector_store %arg6[%c24, %c0_29], %19 {strides = array<i32>} : memref<36x768xf32, #tpu.memory_space<vmem>>, vector<4x384xf32>,
    %c0_30 = arith.constant 0 : index
    %c0_31 = arith.constant 0 : index
    %c0_32 = arith.constant 0 : index
    %c37 = arith.constant 37 : index
    %21 = vector.load %arg1[%c0_30, %c0_31, %c0_32, %c37] : memref<1x2x4x432xf32, #tpu.memory_space<vmem>>, vector<1x1x4x384xf32>
    %22 = vector.shape_cast %21 : vector<1x1x4x384xf32> to vector<4x384xf32>
    %c28 = arith.constant 28 : index
    %c0_33 = arith.constant 0 : index
    %23 = vector.load %arg6[%c28, %c0_33] : memref<36x768xf32, #tpu.memory_space<vmem>>, vector<4x384xf32>
    tpu.vector_store %arg6[%c28, %c0_33], %22 {strides = array<i32>} : memref<36x768xf32, #tpu.memory_space<vmem>>, vector<4x384xf32>,
    %c0_34 = arith.constant 0 : index
    %c0_35 = arith.constant 0 : index
    %c0_36 = arith.constant 0 : index
    %c38 = arith.constant 38 : index
    %24 = vector.load %arg1[%c0_34, %c0_35, %c0_36, %c38] : memref<1x2x4x432xf32, #tpu.memory_space<vmem>>, vector<1x1x4x384xf32>
    %25 = vector.shape_cast %24 : vector<1x1x4x384xf32> to vector<4x384xf32>
    %c32 = arith.constant 32 : index
    %c0_37 = arith.constant 0 : index
    %26 = vector.load %arg6[%c32, %c0_37] : memref<36x768xf32, #tpu.memory_space<vmem>>, vector<4x384xf32>
    tpu.vector_store %arg6[%c32, %c0_37], %25 {strides = array<i32>} : memref<36x768xf32, #tpu.memory_space<vmem>>, vector<4x384xf32>,
    %c0_38 = arith.constant 0 : index
    %c1_39 = arith.constant 1 : index
    %c0_40 = arith.constant 0 : index
    %c0_41 = arith.constant 0 : index
    %27 = vector.load %arg1[%c0_38, %c1_39, %c0_40, %c0_41] : memref<1x2x4x432xf32, #tpu.memory_space<vmem>>, vector<1x1x4x384xf32>
    %28 = vector.shape_cast %27 : vector<1x1x4x384xf32> to vector<4x384xf32>
    %c0_42 = arith.constant 0 : index
    %c384 = arith.constant 384 : index
    %29 = vector.load %arg6[%c0_42, %c384] : memref<36x768xf32, #tpu.memory_space<vmem>>, vector<4x384xf32>
    tpu.vector_store %arg6[%c0_42, %c384], %28 {strides = array<i32>} : memref<36x768xf32, #tpu.memory_space<vmem>>, vector<4x384xf32>,
    %c0_43 = arith.constant 0 : index
    %c1_44 = arith.constant 1 : index
    %c0_45 = arith.constant 0 : index
    %c1_46 = arith.constant 1 : index
    %30 = vector.load %arg1[%c0_43, %c1_44, %c0_45, %c1_46] : memref<1x2x4x432xf32, #tpu.memory_space<vmem>>, vector<1x1x4x384xf32>
    %31 = vector.shape_cast %30 : vector<1x1x4x384xf32> to vector<4x384xf32>
    %c4_47 = arith.constant 4 : index
    %c384_48 = arith.constant 384 : index
    %32 = vector.load %arg6[%c4_47, %c384_48] : memref<36x768xf32, #tpu.memory_space<vmem>>, vector<4x384xf32>
    tpu.vector_store %arg6[%c4_47, %c384_48], %31 {strides = array<i32>} : memref<36x768xf32, #tpu.memory_space<vmem>>, vector<4x384xf32>,
    %c0_49 = arith.constant 0 : index
    %c1_50 = arith.constant 1 : index
    %c0_51 = arith.constant 0 : index
    %c2_52 = arith.constant 2 : index
    %33 = vector.load %arg1[%c0_49, %c1_50, %c0_51, %c2_52] : memref<1x2x4x432xf32, #tpu.memory_space<vmem>>, vector<1x1x4x384xf32>
    %34 = vector.shape_cast %33 : vector<1x1x4x384xf32> to vector<4x384xf32>
    %c8_53 = arith.constant 8 : index
    %c384_54 = arith.constant 384 : index
    %35 = vector.load %arg6[%c8_53, %c384_54] : memref<36x768xf32, #tpu.memory_space<vmem>>, vector<4x384xf32>
    tpu.vector_store %arg6[%c8_53, %c384_54], %34 {strides = array<i32>} : memref<36x768xf32, #tpu.memory_space<vmem>>, vector<4x384xf32>,
    %c0_55 = arith.constant 0 : index
    %c1_56 = arith.constant 1 : index
    %c0_57 = arith.constant 0 : index
    %c18_58 = arith.constant 18 : index
    %36 = vector.load %arg1[%c0_55, %c1_56, %c0_57, %c18_58] : memref<1x2x4x432xf32, #tpu.memory_space<vmem>>, vector<1x1x4x384xf32>
    %37 = vector.shape_cast %36 : vector<1x1x4x384xf32> to vector<4x384xf32>
    %c12_59 = arith.constant 12 : index
    %c384_60 = arith.constant 384 : index
    %38 = vector.load %arg6[%c12_59, %c384_60] : memref<36x768xf32, #tpu.memory_space<vmem>>, vector<4x384xf32>
    tpu.vector_store %arg6[%c12_59, %c384_60], %37 {strides = array<i32>} : memref<36x768xf32, #tpu.memory_space<vmem>>, vector<4x384xf32>,
    %c0_61 = arith.constant 0 : index
    %c1_62 = arith.constant 1 : index
    %c0_63 = arith.constant 0 : index
    %c19_64 = arith.constant 19 : index
    %39 = vector.load %arg1[%c0_61, %c1_62, %c0_63, %c19_64] : memref<1x2x4x432xf32, #tpu.memory_space<vmem>>, vector<1x1x4x384xf32>
    %40 = vector.shape_cast %39 : vector<1x1x4x384xf32> to vector<4x384xf32>
    %c16_65 = arith.constant 16 : index
    %c384_66 = arith.constant 384 : index
    %41 = vector.load %arg6[%c16_65, %c384_66] : memref<36x768xf32, #tpu.memory_space<vmem>>, vector<4x384xf32>
    tpu.vector_store %arg6[%c16_65, %c384_66], %40 {strides = array<i32>} : memref<36x768xf32, #tpu.memory_space<vmem>>, vector<4x384xf32>,
    %c0_67 = arith.constant 0 : index
    %c1_68 = arith.constant 1 : index
    %c0_69 = arith.constant 0 : index
    %c20_70 = arith.constant 20 : index
    %42 = vector.load %arg1[%c0_67, %c1_68, %c0_69, %c20_70] : memref<1x2x4x432xf32, #tpu.memory_space<vmem>>, vector<1x1x4x384xf32>
    %43 = vector.shape_cast %42 : vector<1x1x4x384xf32> to vector<4x384xf32>
    %c20_71 = arith.constant 20 : index
    %c384_72 = arith.constant 384 : index
    %44 = vector.load %arg6[%c20_71, %c384_72] : memref<36x768xf32, #tpu.memory_space<vmem>>, vector<4x384xf32>
    tpu.vector_store %arg6[%c20_71, %c384_72], %43 {strides = array<i32>} : memref<36x768xf32, #tpu.memory_space<vmem>>, vector<4x384xf32>,
    %c0_73 = arith.constant 0 : index
    %c1_74 = arith.constant 1 : index
    %c0_75 = arith.constant 0 : index
    %c36_76 = arith.constant 36 : index
    %45 = vector.load %arg1[%c0_73, %c1_74, %c0_75, %c36_76] : memref<1x2x4x432xf32, #tpu.memory_space<vmem>>, vector<1x1x4x384xf32>
    %46 = vector.shape_cast %45 : vector<1x1x4x384xf32> to vector<4x384xf32>
    %c24_77 = arith.constant 24 : index
    %c384_78 = arith.constant 384 : index
    %47 = vector.load %arg6[%c24_77, %c384_78] : memref<36x768xf32, #tpu.memory_space<vmem>>, vector<4x384xf32>
    tpu.vector_store %arg6[%c24_77, %c384_78], %46 {strides = array<i32>} : memref<36x768xf32, #tpu.memory_space<vmem>>, vector<4x384xf32>,
    %c0_79 = arith.constant 0 : index
    %c1_80 = arith.constant 1 : index
    %c0_81 = arith.constant 0 : index
    %c37_82 = arith.constant 37 : index
    %48 = vector.load %arg1[%c0_79, %c1_80, %c0_81, %c37_82] : memref<1x2x4x432xf32, #tpu.memory_space<vmem>>, vector<1x1x4x384xf32>
    %49 = vector.shape_cast %48 : vector<1x1x4x384xf32> to vector<4x384xf32>
    %c28_83 = arith.constant 28 : index
    %c384_84 = arith.constant 384 : index
    %50 = vector.load %arg6[%c28_83, %c384_84] : memref<36x768xf32, #tpu.memory_space<vmem>>, vector<4x384xf32>
    tpu.vector_store %arg6[%c28_83, %c384_84], %49 {strides = array<i32>} : memref<36x768xf32, #tpu.memory_space<vmem>>, vector<4x384xf32>,
    %c0_85 = arith.constant 0 : index
    %c1_86 = arith.constant 1 : index
    %c0_87 = arith.constant 0 : index
    %c38_88 = arith.constant 38 : index
    %51 = vector.load %arg1[%c0_85, %c1_86, %c0_87, %c38_88] : memref<1x2x4x432xf32, #tpu.memory_space<vmem>>, vector<1x1x4x384xf32>
    %52 = vector.shape_cast %51 : vector<1x1x4x384xf32> to vector<4x384xf32>
    %c32_89 = arith.constant 32 : index
    %c384_90 = arith.constant 384 : index
    %53 = vector.load %arg6[%c32_89, %c384_90] : memref<36x768xf32, #tpu.memory_space<vmem>>, vector<4x384xf32>
    tpu.vector_store %arg6[%c32_89, %c384_90], %52 {strides = array<i32>} : memref<36x768xf32, #tpu.memory_space<vmem>>, vector<4x384xf32>,
    %c0_91 = arith.constant 0 : index
    %c0_92 = arith.constant 0 : index
    %54 = vector.load %arg2[%c0_91, %c0_92] : memref<8x36xf32, #tpu.memory_space<vmem>>, vector<8x36xf32>
    %c0_93 = arith.constant 0 : index
    %c0_94 = arith.constant 0 : index
    %55 = vector.load %arg6[%c0_93, %c0_94] : memref<36x768xf32, #tpu.memory_space<vmem>>, vector<36x768xf32>
    %cst = arith.constant dense<0.000000e+00> : vector<8x768xf32>
    %56 = tpu.matmul %54, %55, %cst {dimension_numbers = #tpu.dot_dimension_numbers<[1], [0], [0], [1], [0, 0, 1, 1], [], []>} : vector<8x36xf32>, vector<36x768xf32>, vector<8x768xf32> -> vector<8x768xf32>
    %c0_95 = arith.constant 0 : index
    %c0_96 = arith.constant 0 : index
    %c0_97 = arith.constant 0 : index
    %57 = vector.load %arg3[%c0_95, %c0_96, %c0_97] : memref<2x8x8xf32, #tpu.memory_space<vmem>>, vector<1x8x8xf32>
    %58 = vector.shape_cast %57 : vector<1x8x8xf32> to vector<8x8xf32>
    %59 = vector.extract_strided_slice %56 {offsets = [0, 0], sizes = [8, 384], strides = [1, 1]} : vector<8x768xf32> to vector<8x384xf32>
    %cst_98 = arith.constant dense<0.000000e+00> : vector<8x384xf32>
    %60 = tpu.matmul %58, %59, %cst_98 {dimension_numbers = #tpu.dot_dimension_numbers<[1], [0], [0], [1], [0, 0, 1, 1], [], []>} : vector<8x8xf32>, vector<8x384xf32>, vector<8x384xf32> -> vector<8x384xf32>
    %c1_99 = arith.constant 1 : index
    %c0_100 = arith.constant 0 : index
    %c0_101 = arith.constant 0 : index
    %61 = vector.load %arg3[%c1_99, %c0_100, %c0_101] : memref<2x8x8xf32, #tpu.memory_space<vmem>>, vector<1x8x8xf32>
    %62 = vector.shape_cast %61 : vector<1x8x8xf32> to vector<8x8xf32>
    %63 = vector.extract_strided_slice %56 {offsets = [0, 384], sizes = [8, 384], strides = [1, 1]} : vector<8x768xf32> to vector<8x384xf32>
    %cst_102 = arith.constant dense<0.000000e+00> : vector<8x384xf32>
    %64 = tpu.matmul %62, %63, %cst_102 {dimension_numbers = #tpu.dot_dimension_numbers<[1], [0], [0], [1], [0, 0, 1, 1], [], []>} : vector<8x8xf32>, vector<8x384xf32>, vector<8x384xf32> -> vector<8x384xf32>
    %65 = arith.addf %60, %64 : vector<8x384xf32>
    %c0_103 = arith.constant 0 : index
    %c0_104 = arith.constant 0 : index
    %66 = vector.load %arg4[%c0_103, %c0_104] : memref<8x1xf32, #tpu.memory_space<vmem>>, vector<8x1xf32>
    %67 = vector.broadcast %66 : vector<8x1xf32> to vector<8x384xf32>
    %68 = arith.addf %65, %67 : vector<8x384xf32>
    %c0_105 = arith.constant 0 : index
    %c0_106 = arith.constant 0 : index
    %c0_107 = arith.constant 0 : index
    %69 = vector.load %arg5[%c0_105, %c0_106, %c0_107] : memref<1x8x384xf32, #tpu.memory_space<vmem>>, vector<1x8x384xf32>
    %70 = vector.shape_cast %69 : vector<1x8x384xf32> to vector<8x384xf32>
    %71 = vector.shape_cast %68 : vector<8x384xf32> to vector<1x8x384xf32>
    tpu.vector_store %arg5[%c0_105, %c0_106, %c0_107], %71 {strides = array<i32>} : memref<1x8x384xf32, #tpu.memory_space<vmem>>, vector<1x8x384xf32>,
    return
  }
  func.func @transform_0(%arg0: i32) -> (i32, i32, i32, i32) {
    %c0_i32 = arith.constant 0 : i32
    %c0_i32_0 = arith.constant 0 : i32
    %c0_i32_1 = arith.constant 0 : i32
    %c0_i32_2 = arith.constant 0 : i32
    return %arg0, %c0_i32, %c0_i32_0, %c0_i32_1 : i32, i32, i32, i32
  }
  func.func @transform_1(%arg0: i32) -> (i32, i32) {
    %c0_i32 = arith.constant 0 : i32
    %c0_i32_0 = arith.constant 0 : i32
    %c0_i32_1 = arith.constant 0 : i32
    return %c0_i32, %c0_i32_0 : i32, i32
  }
  func.func @transform_2(%arg0: i32) -> (i32, i32, i32) {
    %c0_i32 = arith.constant 0 : i32
    %c0_i32_0 = arith.constant 0 : i32
    %c0_i32_1 = arith.constant 0 : i32
    %c0_i32_2 = arith.constant 0 : i32
    return %c0_i32, %c0_i32_0, %c0_i32_1 : i32, i32, i32
  }
  func.func @transform_3(%arg0: i32) -> (i32, i32) {
    %c0_i32 = arith.constant 0 : i32
    %c0_i32_0 = arith.constant 0 : i32
    %c0_i32_1 = arith.constant 0 : i32
    return %c0_i32, %c0_i32_0 : i32, i32
  }
  func.func @transform_4(%arg0: i32) -> (i32, i32, i32) {
    %c0_i32 = arith.constant 0 : i32
    %c0_i32_0 = arith.constant 0 : i32
    %c0_i32_1 = arith.constant 0 : i32
    return %arg0, %c0_i32, %c0_i32_0 : i32, i32, i32
  }
}

</mosaic_0001>

<bundles_post_ra>
// kernel: tpu_custom_call.1
= control target key start
LH: loop header
LB: loop body
LE: loop exit
PB: predicated region body
PF: predicated region fallthrough
CT: control target
= control target key end

     0   :  { %9 = vsyncpa [#allocation4], 0  ;;  %s2064_s0 = inlined_call_operand.hbm [shape: f32[2,2,4,432], index: 0, kind: input, shape index: {}]   ;;  %s2065_s1 = inlined_call_operand.hbm [shape: f32[8,36], index: 1, kind: input, shape index: {}]   ;;  %s2066_s2 = inlined_call_operand.vmem [shape: f32[2,8,8], index: 2, kind: input, shape index: {}]   ;;  %s2067_s3 = inlined_call_operand.vmem [shape: f32[8,1], index: 3, kind: input, shape index: {}]   ;;  %s2068_s4 = inlined_call_operand.hbm [shape: f32[2,8,384], index: 4, kind: output, shape index: {}]  }
   0x1   :  { %11 = vsyncpa [#allocation4 + $0x1], 0 }
   0x2   :  { %12 = vsyncpa [#allocation7], 0 }
   0x3   :  { %13 = vsyncpa [#allocation5], 0 }
   0x4   :  { %15 = vsyncpa [#allocation5 + $0x1], 0  ;;  %s1626_s15 = smov 0   ;;  %s1628_s16 = smov 0  }
   0x5   :  { %s1630_s17 = smov 0   ;;  %s1632_s18 = smov 0  }
   0x6 LB: > { %s1647_s19 = sadd.s32 4294967295, %s1583_s18   ;;  %s1288_s20 = sadd.s32 4294967294, %s1583_s18   ;;  %s1583_s18 = sphi %s1632_s18, %s2093_s18   ;;  %s1579_s17 = sphi %s1630_s17, %s2092_s17   ;;  %s1575_s16 = sphi %s1628_s16, %s2091_s16   ;;  %s1571_s15 = sphi %s1626_s15, %s2090_s15  }
   0x7   : > { %s1651_s21 = sadd.s32 1, %s1583_s18   ;;  %s28_s22 = sadd.s32 1, %s1579_s17 }
   0x8   : > { %s25_s23 = ssub.s32 %s1583_s18, %s1651_s21  ;;  %p35_p0 = scmp.ne.s32.totalorder %s1579_s17, %s1575_s16 }
   0x9   : > { %p26_p1 = scmp.eq.s32.totalorder %s25_s23, 0  ;;  %p36_p2 = scmp.eq.s32.totalorder %s1583_s18, 0 }
   0xa   : > { %p41_p3 = scmp.ne.s32.totalorder %s1575_s16, %s1571_s15  ;;  %p2069_p4 = scmp.eq.s32.totalorder %s1647_s19, 0 }
   0xb   : > { %s1663_s24 = scalar_select %p26_p1, %s1579_s17, %s28_s22  }
   0xc   : > { %p1665_p5 = por %p36_p2, %p35_p0  ;;  %p1671_p6 = por %p2069_p4, %p41_p3 }
   0xd   : > { %p128_p7 = scmp.eq.s32.totalorder %s1647_s19, 1  ;;  %p134_p8 = scmp.eq.s32.totalorder %s1288_s20, 1 }
   0xe   : > { %s2075_s26 = scalar_select %p1671_p6, 1, 0 }
   0xf   : > { %p1289_p9 = scmp.ge.s32.totalorder %s1583_s18, 1  ;;  %p141_p10 = scmp.lt.s32.totalorder %s1583_s18, 3 }
  0x10   : > { %p1678_p11 = por %p128_p7, %p35_p0  ;;  %p1682_p12 = por %p134_p8, %p41_p3 }
  0x11   : > { %p1686_p13 = pnand %p1289_p9, %p141_p10  ;;  %s1585_s30 = smov [#allocation6]  }
  0x12   : > { %s2076_s27 = scalar_select %p1678_p11, 1, 0 }
  0x13   : > { %s2077_s28 = scalar_select %p1682_p12, 1, 0 }
  0x14   : > { %s2078_s29 = scalar_select %p1686_p13, 1, 0 }
  0x15   : > { %p1384_p2 = pneg %p1686_p13  ;;  %s154_s5 = sshll.u32 %s1585_s30, 4  ;;  %s155_s5 = int_to_ptr.vmem [resolvable:$true] %s154_s5 }
  0x16   : > { %p1397_p4 = scmp.lt.s32.totalorder %s1583_s18, 2  ;;  %p2079_p0 = scmp.eq.s32.totalorder %s1647_s19, 0 }
  0x17   : > { %s171_s7 = sand.u32 1, %s1579_s17   ;;  %s1455_s12 = scalar_lea.hbm %s2065_s1, 128 }
  0x18   : > { %p1696_p7 = pnand %p1384_p2, %p2079_p0  ;;  %p1703_p3 = pnand %p1397_p4, %p1665_p5 }
  0x19   : > { %s1292_s9 = sshll.u32 %s171_s7, 5  ;;  %p1456_p8 = scmp.ne.s32.totalorder %s2065_s1, %s1455_s12 }
  0x1a   : > { %s2081_s8 = scalar_select %p1703_p3, 1, 0 }
  0x1b   : > { %p1457_p9 = pneg %p1696_p7  ;;  %p1462_p4 = scmp.lt.u32.totalorder %s1455_s12, %s2065_s1 }
  0x1d   : > { %p1458_p10 = pnand %p1457_p9, %p1456_p8 }
  0x1f   : > { %p1459_p2 = pneg %p1458_p10 }
  0x21   : > { %p1464_p5 = pnand %p1462_p4, %p1459_p2 }
  0x23   : > { %1467 = shalt.err (!%p1464_p5)
}
  0x24   : > { %s1468_s23 = scalar_lea.vmem %s155_s5, 128  ;;  %p1476_p11 = scmp.lt.s32.totalorder %s155_s5, %s155_s5 }
  0x25   : > { %p1469_p0 = scmp.ne.s32.totalorder %s155_s5, %s1468_s23  ;;  %p1477_p6 = scmp.lt.s32.totalorder %s1468_s23, %s1468_s23 }
  0x27   : > { %p1471_p1 = pnand %p1469_p0, %p1457_p9  ;;  %p1478_p13 = por %p1477_p6, %p1476_p11 }
  0x29   : > { %p1472_p12 = pneg %p1471_p1 }
  0x2b   : > { %p1479_p3 = pnand %p1478_p13, %p1472_p12 }
  0x2d   : > { %1482 = shalt.err (!%p1479_p3)
}
  0x2e   : > { %1387 = dma.hbm_to_vmem [thread:$0]  (!%p1696_p7), %s2065_s1, 128, %s155_s5, [#allocation7]  }
  0x2f   : > { %s1333_s10 = sshll.u32 %s1583_s18, 9  ;;  %s175_s11 = scalar_lea.vmem [#allocation3], %s1292_s9 }
  0x30   : > { %s182_s12 = sshll.u32 %s175_s11, 4  ;;  %s1727_s20 = scalar_lea.hbm %s2064_s0, %s1333_s10  ;;  %s1729_s12 = int_to_ptr.vmem [resolvable:$true] %s182_s12 }
  0x31   : > { %s1731_s6 = scalar_lea.sflag [#allocation4], %s171_s7  ;;  %s1483_s22 = scalar_lea.hbm %s1727_s20, 512 }
  0x32   : > { %p1484_p6 = scmp.ne.s32.totalorder %s1727_s20, %s1483_s22  ;;  %p2082_p11 = scmp.ne.s32.totalorder %s2081_s8, 0 }
  0x33   : > { %s1488_s23 = scalar_lea.hbm %s2064_s0, 1024  ;;  %p1489_p7 = scmp.lt.u32.totalorder %s1727_s20, %s2064_s0 }
  0x34   : > { %p1485_p12 = pneg %p2082_p11  ;;  %p1490_p3 = scmp.lt.u32.totalorder %s1488_s23, %s1483_s22 }
  0x35   : > { %p1492_p9 = scmp.lt.u32.totalorder %s1483_s22, %s1727_s20 }
  0x36   : > { %p1486_p13 = pnand %p1485_p12, %p1484_p6  ;;  %p1491_p8 = por %p1490_p3, %p1489_p7 }
  0x38   : > { %p1487_p1 = pneg %p1486_p13  ;;  %p1493_p10 = por %p1492_p9, %p1491_p8 }
  0x3a   : > { %p1494_p2 = pnand %p1493_p10, %p1487_p1 }
  0x3c   : > { %1497 = shalt.err (!%p1494_p2)
}
  0x3d   : > { %s1498_s7 = scalar_lea.vmem %s1729_s12, 512  ;;  %s1586_s10 = smov [#allocation3]  }
  0x3e   : > { %p1499_p4 = scmp.ne.s32.totalorder %s1729_s12, %s1498_s7  ;;  %s1503_s11 = sshll.u32 %s1586_s10, 4  ;;  %s1504_s11 = int_to_ptr.vmem [resolvable:$false] %s1503_s11 }
  0x3f   : > { %s1505_s13 = scalar_lea.vmem %s1504_s11, 1024  ;;  %p1506_p6 = scmp.lt.s32.totalorder %s1729_s12, %s1504_s11 }
  0x40   : > { %p1501_p5 = pnand %p1499_p4, %p1485_p12  ;;  %p1507_p13 = scmp.lt.s32.totalorder %s1505_s13, %s1498_s7 }
  0x42   : > { %p1502_p0 = pneg %p1501_p5  ;;  %p1508_p7 = por %p1507_p13, %p1506_p6 }
  0x44   : > { %p1509_p3 = pnand %p1508_p7, %p1502_p0 }
  0x46   : > { %1512 = shalt.err (!%p1509_p3)
}
  0x47   : > { %s1587_s14 = smov 256   ;;  %s1588_s22 = smov 16  }
  0x48   : > { %1391 = dma.hbm_to_vmem [thread:$0]  (!%p2082_p11), %s1727_s20, 512, %s1729_s12, %s1731_s6, %s1587_s14, %s1587_s14, %s1588_s22  }
  0x49   : > { %p2083_p12 = scmp.ne.s32.totalorder %s2078_s29, 0 }
  0x4a   : > { %s1762_s5 = sand.u32 (!%p2083_p12), 1, %s1575_s16   ;;  %p2084_p1 = scmp.ne.s32.totalorder (!%p2083_p12), %s2075_s26, 0 }
  0x4b   : > { %194 = sbr.rel (%p2083_p12) target bundleno = 788 (0x314), region = 36  ;;  %s1296_s9 = sshll.u32 (!%p2083_p12), %s1762_s5, 5 }
  0x4c   : > { %s197_s23 = scalar_lea.sflag (!%p2083_p12), [#allocation4], %s1762_s5  ;;  %s1766_s25 = scalar_lea.vmem (!%p2083_p12), [#allocation3], %s1296_s9 }
  0x52   : > { %1558 = dma.done.wait (%p2084_p1), %s197_s23, 512  }
  0x53   : > { %1560 = vsyncadd (%p2084_p1), %s197_s23, 4294966784  ;;  %p2085_p11 = scmp.eq.s32.totalorder %s1647_s19, 0 }
  0x55   : > { %1562 = dma.done.wait (%p2085_p11), [#allocation7], 128   ;;  %p2086_p8 = pmov %p2085_p11 }
  0x56   : > { %v1777_v0 = vld [vmem:[%s1766_s25 + $0x8] sm:$0xff]  ;;  %v1780_v1 = vld [vmem:[%s1766_s25] sm:$0xff]  ;;  %v1783_v2 = vld [vmem:[%s1766_s25 + $0x10] sm:$0xff]  ;;  %s1589_s29 = smov 126   ;;  %s1590_s26 = smov 127   ;;  %v1597_v14 = vmov 0.0  }
  0x57   : > { %1564 = vsyncadd (%p2086_p8), [#allocation7], 4294967168  ;;  %271 = vrot.lane.b32.xlu1 %v1777_v0, %s1589_s29  ;;  %245 = vrot.lane.b32.xlu0 %v1780_v1, %s1590_s26  ;;  %v265_v3 = vcombine.high %v1780_v1, %v1780_v1  ;;  %234 = vst [vmem:[#allocation2] sm:$0xf] %v1780_v1  ;;  %v1795_v4 = vcombine.high %v1783_v2, %v1783_v2  ;;  %s1591_s8 = smov 110   ;;  %s1592_s12 = smov 109  }
  0x58   : > { %435 = vst [vmem:[#allocation2 + $0x18] sm:$0xf] %v1783_v2  ;;  %v290_v5 = vcombine.low %v1777_v0, %v1777_v0  ;;  %v241_v6 = vcombine.low %v1780_v1, %v1780_v1  ;;  %s1593_s20 = smov 108   ;;  %s1594_s6 = smov 92   ;;  %v1299_v7 = vld [vmem:[%s1766_s25 + $0x18] sm:$0xf]  ;;  %v442_v8 = vcombine.low %v1783_v2, %v1783_v2  ;;  %v266_v13 = vcombine.high %v1777_v0, %v1777_v0 }
  0x59   : > { %235 = vst [vmem:[#allocation2 + $0x8] sm:$0xf] %v265_v3  ;;  %436 = vst [vmem:[#allocation2 + $0x20] sm:$0xf] %v1795_v4  ;;  %s1595_s30 = smov 91   ;;  %s1596_s7 = smov 90   ;;  %740 = vmatprep.mubr.f32.mxu0 %v1597_v14  ;;  %811 = vmatprep.mubr.f32.mxu1 %v1597_v14 }
  0x5a   : > { %437 = vst [vmem:[#allocation2 + $0x28] sm:$0xf] %v1299_v7  ;;  %v1301_v9 = vld [vmem:[%s1766_s25 + $0x18] sm:$0xff]  ;;  %v230_v11 = vld [vmem:[%s1766_s25 + $0x8] sm:$0xf]  ;;  %vm275_vm0 = vcmask 1031168  }
  0x5b   : > { %269 = vrot.lane.b32.xlu1 %v265_v3, %s1589_s29  ;;  %293 = vrot.lane.b32.xlu0 %v1780_v1, %s1591_s8  ;;  %v443_v10 = vcombine.low %v1301_v9, %v1301_v9  ;;  %v466_v12 = vcombine.high %v1301_v9, %v1301_v9  ;;  %236 = vst [vmem:[#allocation2 + $0x10] sm:$0xf] %v230_v11  ;;  %vm299_vm1 = vcmask 900096   ;;  %vm251_vm2 = vcmask 1039360   ;;  %s1374_s23 = smul.u32 24, %s1762_s5  ;;  %p2087_p10 = scmp.ne.s32.totalorder %s2076_s27, 0 }
  0x5c   : > { %vm323_vm3 = vcmask 891904   ;;  %vm347_vm4 = vcmask 883712   ;;  %vm371_vm5 = vcmask 752640   ;;  %vm395_vm6 = vcmask 744448   ;;  %s1375_s25 = smul.u32 384, %s1647_s19  ;;  %s1194_s19 = scalar_lea.sflag [#allocation5], %s1762_s5 }
  0x5d   : > { %vm419_vm7 = vcmask 736256   ;;  %vm657_vm8 = vcmask 1043456   ;;  %vm653_vm9 = vcmask 293888   ;;  %vm1598_vm10 = vmmov 0  }
  0x5e   : > { %vm892_vm11 = vcmask 64512  }
  0x5f   : > { %295 = vrot.lane.b32.xlu1 %v290_v5, %s1591_s8  ;;  %247 = vrot.lane.b32.xlu0 %v290_v5, %s1590_s26 }
  0x63   : > { %267 = vrot.lane.b32.xlu1 %v1780_v1, %s1589_s29  ;;  %243 = vrot.lane.b32.xlu0 %v241_v6, %s1590_s26 }
  0x67   : > { %317 = vrot.lane.b32.xlu1 %v265_v3, %s1592_s12  ;;  %291 = vrot.lane.b32.xlu0 %v241_v6, %s1591_s8 }
  0x6b   : > { %341 = vrot.lane.b32.xlu1 %v1780_v1, %s1593_s20  ;;  %319 = vrot.lane.b32.xlu0 %v1777_v0, %s1592_s12 }
  0x6f   : > { %365 = vrot.lane.b32.xlu1 %v265_v3, %s1594_s6  ;;  %343 = vrot.lane.b32.xlu0 %v290_v5, %s1593_s20 }
  0x73   : > { %389 = vrot.lane.b32.xlu1 %v1780_v1, %s1595_s30  ;;  %367 = vrot.lane.b32.xlu0 %v1777_v0, %s1594_s6 }
  0x77   : > { %315 = vrot.lane.b32.xlu1 %v1780_v1, %s1592_s12  ;;  %391 = vrot.lane.b32.xlu0 %v290_v5, %s1595_s30 }
  0x7b   : > { %363 = vrot.lane.b32.xlu1 %v1780_v1, %s1594_s6  ;;  %339 = vrot.lane.b32.xlu0 %v241_v6, %s1593_s20 }
  0x7f   : > { %413 = vrot.lane.b32.xlu1 %v265_v3, %s1596_s7  ;;  %387 = vrot.lane.b32.xlu0 %v241_v6, %s1595_s30 }
  0x83   : > { %444 = vrot.lane.b32.xlu1 %v442_v8, %s1590_s26  ;;  %415 = vrot.lane.b32.xlu0 %v1777_v0, %s1596_s7 }
  0x87   : > { %448 = vrot.lane.b32.xlu1 %v443_v10, %s1590_s26  ;;  %446 = vrot.lane.b32.xlu0 %v1783_v2, %s1590_s26 }
  0x8b   : > { %467 = vrot.lane.b32.xlu1 %v1783_v2, %s1589_s29  ;;  %450 = vrot.lane.b32.xlu0 %v1301_v9, %s1590_s26 }
  0x8f   : > { %471 = vrot.lane.b32.xlu1 %v1301_v9, %s1589_s29  ;;  %469 = vrot.lane.b32.xlu0 %v1795_v4, %s1589_s29 }
  0x93   : > { %490 = vrot.lane.b32.xlu1 %v442_v8, %s1591_s8  ;;  %473 = vrot.lane.b32.xlu0 %v466_v12, %s1589_s29 }
  0x97   : > { %494 = vrot.lane.b32.xlu1 %v443_v10, %s1591_s8  ;;  %492 = vrot.lane.b32.xlu0 %v1783_v2, %s1591_s8 }
  0x9b   : > { %249 = vrot.lane.b32.xlu1 %v1777_v0, %s1590_s26  ;;  %496 = vrot.lane.b32.xlu0 %v1301_v9, %s1591_s8 }
  0x9f   : > { %297 = vrot.lane.b32.xlu1 %v1777_v0, %s1591_s8  ;;  %273 = vrot.lane.b32.xlu0 %v266_v13, %s1589_s29  ;;  %s228_s29 = scalar_lea.vmem [#allocation8], %s1374_s23 }
  0xa0   : > { %s1208_s26 = sshll.u32 %s228_s29, 4  ;;  %s2022_s26 = int_to_ptr.vmem [resolvable:$true] %s1208_s26 }
  0xa3   : > { %513 = vrot.lane.b32.xlu1 %v1783_v2, %s1592_s12  ;;  %411 = vrot.lane.b32.xlu0 %v1780_v1, %s1596_s7 }
  0xa7   : > { %517 = vrot.lane.b32.xlu1 %v1301_v9, %s1592_s12  ;;  %515 = vrot.lane.b32.xlu0 %v1795_v4, %s1592_s12 }
  0xab   : > { %536 = vrot.lane.b32.xlu1 %v442_v8, %s1593_s20  ;;  %519 = vrot.lane.b32.xlu0 %v466_v12, %s1592_s12 }
  0xaf   : > { %540 = vrot.lane.b32.xlu1 %v443_v10, %s1593_s20  ;;  %538 = vrot.lane.b32.xlu0 %v1783_v2, %s1593_s20 }
  0xb3   : > { %559 = vrot.lane.b32.xlu1 %v1783_v2, %s1594_s6  ;;  %542 = vrot.lane.b32.xlu0 %v1301_v9, %s1593_s20 }
  0xb7   : > { %563 = vrot.lane.b32.xlu1 %v1301_v9, %s1594_s6  ;;  %561 = vrot.lane.b32.xlu0 %v1795_v4, %s1594_s6 }
  0xbb   : > { %582 = vrot.lane.b32.xlu1 %v442_v8, %s1595_s30  ;;  %565 = vrot.lane.b32.xlu0 %v466_v12, %s1594_s6 }
  0xbf   : > { %586 = vrot.lane.b32.xlu1 %v443_v10, %s1595_s30  ;;  %584 = vrot.lane.b32.xlu0 %v1783_v2, %s1595_s30 }
  0xc3   : > { %321 = vrot.lane.b32.xlu1 %v266_v13, %s1592_s12  ;;  %588 = vrot.lane.b32.xlu0 %v1301_v9, %s1595_s30 }
  0xc7   : > { %369 = vrot.lane.b32.xlu1 %v266_v13, %s1594_s6  ;;  %345 = vrot.lane.b32.xlu0 %v1777_v0, %s1593_s20  ;;  %s2020_s20 = scalar_lea.hbm %s2068_s4, %s1375_s25  ;;  %s1513_s6 = scalar_lea.vmem %s2022_s26, 384 }
  0xc8   : > { %p1514_p9 = scmp.ne.s32.totalorder %s2022_s26, %s1513_s6 }
  0xc9   : > { %v1890_v15 = vpop.permute.xlu1 %271  ;;  %v246_v16 = vpop.permute.xlu0 %245 }
  0xca   : > { %p1515_p2 = pnand %p1514_p9, %p2087_p10 }
  0xcb   : > { %605 = vrot.lane.b32.xlu1 %v1783_v2, %s1596_s7  ;;  %393 = vrot.lane.b32.xlu0 %v1777_v0, %s1595_s30  ;;  %s1600_s30 = smov [#allocation8]  }
  0xcc   : > { %p1516_p4 = pneg %p1515_p2 }
  0xcd   : > { %v270_v17 = vpop.permute.xlu1 %269  ;;  %v294_v18 = vpop.permute.xlu0 %293 }
  0xce   : > { %v277_v19 = vsel %vm275_vm0, %v270_v17, %v1890_v15 }
  0xcf   : > { %283 = vst [vmem:[#allocation2 + $0x38] sm:$0xf] %v277_v19  ;;  %609 = vrot.lane.b32.xlu1 %v1301_v9, %s1596_s7  ;;  %607 = vrot.lane.b32.xlu0 %v1795_v4, %s1596_s7 }
  0xd1   : > { %v1901_v20 = vpop.permute.xlu1 %295  ;;  %v1903_v21 = vpop.permute.xlu0 %247 }
  0xd2   : > { %v301_v22 = vsel %vm299_vm1, %v294_v18, %v1901_v20  ;;  %v253_v23 = vsel %vm251_vm2, %v246_v16, %v1903_v21 }
  0xd3   : > { %307 = vst [vmem:[#allocation2 + $0x38] sm:$0xf0] %v301_v22  ;;  %259 = vst [vmem:[#allocation2 + $0x8] sm:$0xf0] %v253_v23  ;;  %417 = vrot.lane.b32.xlu1 %v266_v13, %s1596_s7  ;;  %611 = vrot.lane.b32.xlu0 %v466_v12, %s1596_s7  ;;  %s1517_s7 = sshll.u32 %s1600_s30, 4  ;;  %s1518_s7 = int_to_ptr.vmem [resolvable:$false] %s1517_s7 }
  0xd4   : > { %s1519_s10 = scalar_lea.vmem %s1518_s7, 768  ;;  %p1520_p5 = scmp.lt.s32.totalorder %s2022_s26, %s1518_s7 }
  0xd5   : > { %v268_v24 = vpop.permute.xlu1 %267  ;;  %v244_v25 = vpop.permute.xlu0 %243  ;;  %p1521_p0 = scmp.lt.s32.totalorder %s1519_s10, %s1513_s6 }
  0xd6   : > { %v276_v26 = vsel %vm275_vm0, %v268_v24, %v270_v17  ;;  %v252_v27 = vsel %vm251_vm2, %v244_v25, %v246_v16 }
  0xd7   : > { %282 = vst [vmem:[#allocation2 + $0x30] sm:$0xf] %v276_v26  ;;  %258 = vst [vmem:[#allocation2] sm:$0xf0] %v252_v27  ;;  %p1522_p6 = por %p1521_p0, %p1520_p5 }
  0xd9   : > { %v318_v28 = vpop.permute.xlu1 %317  ;;  %v292_v29 = vpop.permute.xlu0 %291  ;;  %p1523_p13 = pnand %p1522_p6, %p1516_p4 }
  0xda   : > { %v300_v30 = vsel %vm299_vm1, %v292_v29, %v294_v18  ;;  %v624_v31 = vld [vmem:[#allocation2 + $0x8] sm:$0xff]  ;;  %v630_v32 = vld [vmem:[#allocation2 + $0x38] sm:$0xff] }
  0xdb   : > { %306 = vst [vmem:[#allocation2 + $0x30] sm:$0xf0] %v300_v30  ;;  %v1348_v33 = vpack.c.bf16 %v630_v32, %v624_v31 }
  0xdd   : > { %v342_v34 = vpop.permute.xlu1 %341  ;;  %v1914_v35 = vpop.permute.xlu0 %319  ;;  %1349 = vmatprep.subr.bf16.mxu0 %v1348_v33 }
  0xde   : > { %v325_v36 = vsel %vm323_vm3, %v318_v28, %v1914_v35  ;;  %v623_v40 = vld [vmem:[#allocation2] sm:$0xff] }
  0xdf   : > { %331 = vst [vmem:[#allocation2 + $0x68] sm:$0xf] %v325_v36 }
  0xe1   : > { %v366_v37 = vpop.permute.xlu1 %365  ;;  %v1918_v38 = vpop.permute.xlu0 %343 }
  0xe2   : > { %v349_v39 = vsel %vm347_vm4, %v342_v34, %v1918_v38  ;;  %v629_v41 = vld [vmem:[#allocation2 + $0x30] sm:$0xff] }
  0xe3   : > { %355 = vst [vmem:[#allocation2 + $0x68] sm:$0xf0] %v349_v39  ;;  %v1350_v42 = vpack.c.bf16 %v629_v41, %v623_v40 }
  0xe5   : > { %v390_v43 = vpop.permute.xlu1 %389  ;;  %v1922_v44 = vpop.permute.xlu0 %367  ;;  %1351 = vmatpush1.bf16.msra.mxu0 %v1350_v42 }
  0xe6   : > { %v373_v45 = vsel %vm371_vm5, %v366_v37, %v1922_v44 }
  0xe7   : > { %379 = vst [vmem:[#allocation2 + $0x98] sm:$0xf] %v373_v45 }
  0xe9   : > { %v316_v46 = vpop.permute.xlu1 %315  ;;  %v1926_v47 = vpop.permute.xlu0 %391 }
  0xea   : > { %v324_v48 = vsel %vm323_vm3, %v316_v46, %v318_v28  ;;  %v397_v49 = vsel %vm395_vm6, %v390_v43, %v1926_v47  ;;  %v636_v57 = vld [vmem:[#allocation2 + $0x68] sm:$0xff] }
  0xeb   : > { %330 = vst [vmem:[#allocation2 + $0x60] sm:$0xf] %v324_v48  ;;  %403 = vst [vmem:[#allocation2 + $0x98] sm:$0xf0] %v397_v49 }
  0xed   : > { %v364_v50 = vpop.permute.xlu1 %363  ;;  %v340_v51 = vpop.permute.xlu0 %339 }
  0xee   : > { %v372_v52 = vsel %vm371_vm5, %v364_v50, %v366_v37  ;;  %v348_v53 = vsel %vm347_vm4, %v340_v51, %v342_v34 }
  0xef   : > { %378 = vst [vmem:[#allocation2 + $0x90] sm:$0xf] %v372_v52  ;;  %354 = vst [vmem:[#allocation2 + $0x60] sm:$0xf0] %v348_v53  ;;  %v1961_v52 = vld [vmem:[#allocation6] sm:$0xff] }
  0xf1   : > { %v1933_v54 = vpop.permute.xlu1 %413  ;;  %v388_v55 = vpop.permute.xlu0 %387 }
  0xf2   : > { %v396_v56 = vsel %vm395_vm6, %v388_v55, %v390_v43  ;;  %v642_v58 = vld [vmem:[#allocation2 + $0x98] sm:$0xff] }
  0xf3   : > { %402 = vst [vmem:[#allocation2 + $0x90] sm:$0xf0] %v396_v56  ;;  %v1352_v59 = vpack.c.bf16 %v642_v58, %v636_v57 }
  0xf5   : > { %v445_v60 = vpop.permute.xlu1 %444  ;;  %v1936_v61 = vpop.permute.xlu0 %415  ;;  %1353 = vmatprep.subr.bf16.mxu0 %v1352_v59 }
  0xf6   : > { %v421_v62 = vsel %vm419_vm7, %v1933_v54, %v1936_v61  ;;  %v635_v3 = vld [vmem:[#allocation2 + $0x60] sm:$0xff] }
  0xf7   : > { %427 = vst [vmem:[#allocation2 + $0xc8] sm:$0xf] %v421_v62 }
  0xf9   : > { %v449_v63 = vpop.permute.xlu1 %448  ;;  %v447_v0 = vpop.permute.xlu0 %446 }
  0xfa   : > { %v452_v1 = vsel %vm251_vm2, %v445_v60, %v447_v0  ;;  %v453_v2 = vsel %vm251_vm2, %v447_v0, %v449_v63  ;;  %v641_v4 = vld [vmem:[#allocation2 + $0x90] sm:$0xff] }
  0xfb   : > { %458 = vst [vmem:[#allocation2 + $0x18] sm:$0xf0] %v452_v1  ;;  %459 = vst [vmem:[#allocation2 + $0x20] sm:$0xf0] %v453_v2  ;;  %v1354_v5 = vpack.c.bf16 %v641_v4, %v635_v3 }
  0xfd   : > { %v468_v6 = vpop.permute.xlu1 %467  ;;  %v451_v7 = vpop.permute.xlu0 %450  ;;  %1355 = vmatpush1.bf16.msra.mxu0 %v1354_v5 }
  0xfe   : > { %v454_v8 = vsel %vm251_vm2, %v449_v63, %v451_v7  ;;  %v648_v9 = vld [vmem:[#allocation2 + $0xc8] sm:$0xf] }
  0xff   : > { %460 = vst [vmem:[#allocation2 + $0x28] sm:$0xf0] %v454_v8  ;;  %1316 = vmatprep.subr.msk.mxu0 %vm657_vm8, %v648_v9 }
 0x101   : > { %v472_v10 = vpop.permute.xlu1 %471  ;;  %v470_v11 = vpop.permute.xlu0 %469 }
 0x102   : > { %v475_v12 = vsel %vm275_vm0, %v468_v6, %v470_v11  ;;  %v476_v13 = vsel %vm275_vm0, %v470_v11, %v472_v10  ;;  %v626_v33 = vld [vmem:[#allocation2 + $0x18] sm:$0xff]  ;;  %v627_v56 = vld [vmem:[#allocation2 + $0x20] sm:$0xff] }
 0x103   : > { %481 = vst [vmem:[#allocation2 + $0x48] sm:$0xf] %v475_v12  ;;  %482 = vst [vmem:[#allocation2 + $0x50] sm:$0xf] %v476_v13 }
 0x105   : > { %v491_v16 = vpop.permute.xlu1 %490  ;;  %v474_v17 = vpop.permute.xlu0 %473 }
 0x106   : > { %v477_v18 = vsel %vm275_vm0, %v472_v10, %v474_v17  ;;  %v628_v51 = vld [vmem:[#allocation2 + $0x28] sm:$0xff] }
 0x107   : > { %483 = vst [vmem:[#allocation2 + $0x58] sm:$0xf] %v477_v18 }
 0x109   : > { %v495_v19 = vpop.permute.xlu1 %494  ;;  %v493_v22 = vpop.permute.xlu0 %492 }
 0x10a   : > { %v498_v23 = vsel %vm299_vm1, %v491_v16, %v493_v22  ;;  %v499_v24 = vsel %vm299_vm1, %v493_v22, %v495_v19 }
 0x10b   : > { %504 = vst [vmem:[#allocation2 + $0x48] sm:$0xf0] %v498_v23  ;;  %505 = vst [vmem:[#allocation2 + $0x50] sm:$0xf0] %v499_v24 }
 0x10d   : > { %v250_v25 = vpop.permute.xlu1 %249  ;;  %v497_v26 = vpop.permute.xlu0 %496 }
 0x10e   : > { %v254_v27 = vsel %vm251_vm2, %v1903_v21, %v250_v25  ;;  %v500_v28 = vsel %vm299_vm1, %v495_v19, %v497_v26 }
 0x10f   : > { %260 = vst [vmem:[#allocation2 + $0x10] sm:$0xf0] %v254_v27  ;;  %506 = vst [vmem:[#allocation2 + $0x58] sm:$0xf0] %v500_v28 }
 0x111   : > { %v298_v29 = vpop.permute.xlu1 %297  ;;  %v274_v30 = vpop.permute.xlu0 %273 }
 0x112   : > { %v302_v31 = vsel %vm299_vm1, %v1901_v20, %v298_v29  ;;  %v278_v32 = vsel %vm275_vm0, %v1890_v15, %v274_v30  ;;  %v632_v34 = vld [vmem:[#allocation2 + $0x48] sm:$0xff]  ;;  %v633_v48 = vld [vmem:[#allocation2 + $0x50] sm:$0xff] }
 0x113   : > { %308 = vst [vmem:[#allocation2 + $0x40] sm:$0xf0] %v302_v31  ;;  %284 = vst [vmem:[#allocation2 + $0x40] sm:$0xf] %v278_v32  ;;  %v1356_v36 = vpack.c.bf16 %v632_v34, %v626_v33  ;;  %v1366_v57 = vpack.c.bf16 %v633_v48, %v627_v56  ;;  %v1325_v56 = vld [vmem:[%s2066_s2 + $0x8] sm:$0xff] }
 0x115   : > { %v514_v37 = vpop.permute.xlu1 %513  ;;  %1357 = vmatprep.subr.bf16.mxu1 %v1356_v36  ;;  %v412_v21 = vpop.permute.xlu0 %411 }
 0x116   : > { %v420_v39 = vsel %vm419_vm7, %v412_v21, %v1933_v54  ;;  %v625_v43 = vld [vmem:[#allocation2 + $0x10] sm:$0xff]  ;;  %v634_v46 = vld [vmem:[#allocation2 + $0x58] sm:$0xff] }
 0x117   : > { %426 = vst [vmem:[#allocation2 + $0xc0] sm:$0xf] %v420_v39  ;;  %v1364_v55 = vpack.c.bf16 %v634_v46, %v628_v51 }
 0x119   : > { %v518_v40 = vpop.permute.xlu1 %517  ;;  %v516_v41 = vpop.permute.xlu0 %515 }
 0x11a   : > { %v521_v42 = vsel %vm323_vm3, %v514_v37, %v516_v41  ;;  %v522_v20 = vsel %vm323_vm3, %v516_v41, %v518_v40  ;;  %v631_v15 = vld [vmem:[#allocation2 + $0x40] sm:$0xff] }
 0x11b   : > { %527 = vst [vmem:[#allocation2 + $0x78] sm:$0xf] %v521_v42  ;;  %528 = vst [vmem:[#allocation2 + $0x80] sm:$0xf] %v522_v20  ;;  %v1358_v45 = vpack.c.bf16 %v631_v15, %v625_v43 }
 0x11d   : > { %v537_v49 = vpop.permute.xlu1 %536  ;;  %v520_v50 = vpop.permute.xlu0 %519  ;;  %1359 = vmatpush1.bf16.msra.mxu1 %v1358_v45 }
 0x11e   : > { %v523_v53 = vsel %vm323_vm3, %v518_v40, %v520_v50  ;;  %v647_v54 = vld [vmem:[#allocation2 + $0xc0] sm:$0xf] }
 0x11f   : > { %529 = vst [vmem:[#allocation2 + $0x88] sm:$0xf] %v523_v53  ;;  %1317 = vmatpush1.msk.msra.mxu0 %vm657_vm8, %v647_v54 }
 0x120   : > { %1365 = vmatprep.subr.bf16.mxu0 %v1364_v55  ;;  %1318 = vmatmul.mubr.msk.f32.vlgmr.msra.gmra.mrb[0].mxu0 %vm653_vm9, %v1961_v52 }
 0x121   : > { %v541_v58 = vpop.permute.xlu1 %540  ;;  %v539_v59 = vpop.permute.xlu0 %538  ;;  %1367 = vmatpush1.bf16.msra.mxu0 %v1366_v57  ;;  %882 = vmatprep.mubr.f32.mxu0 %v1597_v14 }
 0x122   : > { %v544_v60 = vsel %vm347_vm4, %v537_v49, %v539_v59  ;;  %v545_v62 = vsel %vm347_vm4, %v539_v59, %v541_v58  ;;  %v1599_v49 = vmov 0  }
 0x123   : > { %550 = vst [vmem:[#allocation2 + $0x78] sm:$0xf0] %v544_v60  ;;  %551 = vst [vmem:[#allocation2 + $0x80] sm:$0xf0] %v545_v62  ;;  %1446 = vset.pattern.permute.xlu0 %v1599_v49 }
 0x125   : > { %v560_v63 = vpop.permute.xlu1 %559  ;;  %v543_v0 = vpop.permute.xlu0 %542 }
 0x126   : > { %v546_v1 = vsel %vm347_vm4, %v541_v58, %v543_v0 }
 0x127   : > { %552 = vst [vmem:[#allocation2 + $0x88] sm:$0xf0] %v546_v1 }
 0x129   : > { %v564_v2 = vpop.permute.xlu1 %563  ;;  %v562_v3 = vpop.permute.xlu0 %561 }
 0x12a   : > { %v567_v4 = vsel %vm371_vm5, %v560_v63, %v562_v3  ;;  %v568_v5 = vsel %vm371_vm5, %v562_v3, %v564_v2  ;;  %v638_v25 = vld [vmem:[#allocation2 + $0x78] sm:$0xff] }
 0x12b   : > { %573 = vst [vmem:[#allocation2 + $0xa8] sm:$0xf] %v567_v4  ;;  %574 = vst [vmem:[#allocation2 + $0xb0] sm:$0xf] %v568_v5 }
 0x12d   : > { %v583_v6 = vpop.permute.xlu1 %582  ;;  %v566_v7 = vpop.permute.xlu0 %565 }
 0x12e   : > { %v569_v8 = vsel %vm371_vm5, %v564_v2, %v566_v7  ;;  %v640_v31 = vld [vmem:[#allocation2 + $0x88] sm:$0xff] }
 0x12f   : > { %575 = vst [vmem:[#allocation2 + $0xb8] sm:$0xf] %v569_v8 }
 0x131   : > { %v587_v9 = vpop.permute.xlu1 %586  ;;  %v585_v10 = vpop.permute.xlu0 %584 }
 0x132   : > { %v590_v11 = vsel %vm395_vm6, %v583_v6, %v585_v10  ;;  %v591_v12 = vsel %vm395_vm6, %v585_v10, %v587_v9 }
 0x133   : > { %596 = vst [vmem:[#allocation2 + $0xa8] sm:$0xf0] %v590_v11  ;;  %597 = vst [vmem:[#allocation2 + $0xb0] sm:$0xf0] %v591_v12 }
 0x135   : > { %v322_v13 = vpop.permute.xlu1 %321  ;;  %v589_v16 = vpop.permute.xlu0 %588 }
 0x136   : > { %v326_v17 = vsel %vm323_vm3, %v1914_v35, %v322_v13  ;;  %v592_v18 = vsel %vm395_vm6, %v587_v9, %v589_v16 }
 0x137   : > { %332 = vst [vmem:[#allocation2 + $0x70] sm:$0xf] %v326_v17  ;;  %598 = vst [vmem:[#allocation2 + $0xb8] sm:$0xf0] %v592_v18 }
 0x139   : > { %v370_v19 = vpop.permute.xlu1 %369  ;;  %v346_v22 = vpop.permute.xlu0 %345 }
 0x13a   : > { %v374_v23 = vsel %vm371_vm5, %v1922_v44, %v370_v19  ;;  %v350_v24 = vsel %vm347_vm4, %v1918_v38, %v346_v22  ;;  %v644_v26 = vld [vmem:[#allocation2 + $0xa8] sm:$0xff]  ;;  %v645_v35 = vld [vmem:[#allocation2 + $0xb0] sm:$0xff]  ;;  %v639_v44 = vld [vmem:[#allocation2 + $0x80] sm:$0xff] }
 0x13b   : > { %380 = vst [vmem:[#allocation2 + $0xa0] sm:$0xf] %v374_v23  ;;  %356 = vst [vmem:[#allocation2 + $0x70] sm:$0xf0] %v350_v24  ;;  %v1360_v27 = vpack.c.bf16 %v644_v26, %v638_v25  ;;  %v1370_v34 = vpack.c.bf16 %v645_v35, %v639_v44 }
 0x13d   : > { %v606_v28 = vpop.permute.xlu1 %605  ;;  %v394_v29 = vpop.permute.xlu0 %393  ;;  %1361 = vmatprep.subr.bf16.mxu1 %v1360_v27 }
 0x13e   : > { %v398_v30 = vsel %vm395_vm6, %v1926_v47, %v394_v29  ;;  %v646_v32 = vld [vmem:[#allocation2 + $0xb8] sm:$0xff] }
 0x13f   : > { %404 = vst [vmem:[#allocation2 + $0xa0] sm:$0xf0] %v398_v30  ;;  %v1368_v33 = vpack.c.bf16 %v646_v32, %v640_v31 }
 0x141   : > { %v610_v36 = vpop.permute.xlu1 %609  ;;  %v608_v38 = vpop.permute.xlu0 %607  ;;  %1369 = vmatprep.subr.bf16.mxu0 %v1368_v33 }
 0x142   : > { %v613_v37 = vsel %vm419_vm7, %v606_v28, %v608_v38  ;;  %v614_v21 = vsel %vm419_vm7, %v608_v38, %v610_v36  ;;  %1371 = vmatpush1.bf16.msra.mxu0 %v1370_v34  ;;  %v637_v42 = vld [vmem:[#allocation2 + $0x70] sm:$0xff] }
 0x143   : > { %619 = vst [vmem:[#allocation2 + $0xd8] sm:$0xf] %v613_v37  ;;  %620 = vst [vmem:[#allocation2 + $0xe0] sm:$0xf] %v614_v21 }
 0x145   : > { %v418_v39 = vpop.permute.xlu1 %417  ;;  %v612_v40 = vpop.permute.xlu0 %611 }
 0x146   : > { %v422_v47 = vsel %vm419_vm7, %v1936_v61, %v418_v39  ;;  %v615_v41 = vsel %vm419_vm7, %v610_v36, %v612_v40  ;;  %v643_v20 = vld [vmem:[#allocation2 + $0xa0] sm:$0xff] }
 0x147   : > { %428 = vst [vmem:[#allocation2 + $0xd0] sm:$0xf] %v422_v47  ;;  %621 = vst [vmem:[#allocation2 + $0xe8] sm:$0xf] %v615_v41  ;;  %v1362_v43 = vpack.c.bf16 %v643_v20, %v637_v42  ;;  %v1181_v61 = vld [vmem:[%s2067_s3] sm:$0xff] }
 0x148   : > { %1184 = vperm.xlu0 %1446, %v1181_v61  }
 0x149   : > { %1363 = vmatpush1.bf16.msra.mxu1 %v1362_v43 }
 0x14a   : > { %v650_v15 = vld [vmem:[#allocation2 + $0xd8] sm:$0xf]  ;;  %v651_v48 = vld [vmem:[#allocation2 + $0xe0] sm:$0xf] }
 0x14b   : > { %1319 = vmatprep.subr.msk.mxu1 %vm657_vm8, %v650_v15 }
 0x14e   : > { %v649_v45 = vld [vmem:[#allocation2 + $0xd0] sm:$0xf]  ;;  %v652_v46 = vld [vmem:[#allocation2 + $0xe8] sm:$0xf] }
 0x14f   : > { %1320 = vmatpush1.msk.msra.mxu1 %vm657_vm8, %v649_v45  ;;  %1322 = vmatprep.subr.msk.mxu0 %vm657_vm8, %v652_v46 }
 0x150   : > { %1321 = vmatmul.mubr.msk.f32.vlgmr.msra.gmra.mrb[0].mxu1 %vm653_vm9, %v1961_v52  ;;  %1323 = vmatpush1.msk.msra.mxu0 %vm657_vm8, %v651_v48 }
 0x151   : > { %1324 = vmatmul.mubr.msk.f32.vlgmr.msra.gmra.mrb[2].mxu0 %vm653_vm9, %v1961_v52  ;;  %1343 = vmatprep.subr.mxu0 %v1597_v14  ;;  %v889_v52 = vld [vmem:[%s2066_s2] sm:$0xff] }
 0x152   : > { %960 = vmatprep.mubr.f32.mxu1 %v1597_v14  ;;  %1345 = vmatprep.mubr.msk.f32.mxu0 %vm1598_vm10, %v1597_v14 }
 0x1c7   : > { %v1185_v62 = vpop.permute.xlu0 %1184 }
 0x1f3   : > { %v742_v50 = vpop.f32.mrb[0].mxu0 }
 0x1f4   : > { %v744_v51 = vpop.f32.mrb[1].mxu0 }
 0x223   : > { %v813_v53 = vpop.f32.mrb[0].mxu1 }
 0x224   : > { %v815_v54 = vpop.f32.mrb[1].mxu1  ;;  %v884_v55 = vpop.f32.mrb[2].mxu0  ;;  %1344 = vmatpush3.msra.mxu0 %v813_v53 }
 0x225   : > { %v886_v57 = vpop.f32.mrb[3].mxu0  ;;  %896 = vmatprep.subr.mxu1 %v884_v55  ;;  %1346 = vmatmul.mubr.msk.f32.vlgmr.msra.gmra.mrb[4].mxu0 %vm892_vm11, %v889_v52 }
 0x226   : > { %897 = vmatpush1.msra.mxu1 %v815_v54 }
 0x227   : > { %1326 = vmatmul.mubr.msk.f32.vlgmr.msra.gmra.mrb[2].mxu1 %vm892_vm11, %v1325_v56  ;;  %1338 = vmatprep.subr.mxu1 %v1597_v14 }
 0x228   : > { %1339 = vmatpush3.msra.mxu1 %v886_v57  ;;  %1340 = vmatprep.mubr.msk.f32.mxu1 %vm1598_vm10, %v1597_v14 }
 0x229   : > { %1040 = vmatprep.subr.mxu1 %v744_v51 }
 0x22b   : > { %1341 = vmatmul.mubr.msk.f32.vlgmr.msra.gmra.mrb[4].mxu1 %vm892_vm11, %v1325_v56 }
 0x22c   : > { %1041 = vmatpush1.msra.mxu1 %v742_v50  ;;  %1104 = vmatprep.mubr.f32.mxu1 %v1597_v14 }
 0x22f   : > { %1328 = vmatmul.mubr.msk.f32.vlgmr.msra.gmra.mrb[2].mxu1 %vm892_vm11, %v889_v52 }
 0x2f8   : > { %v1177_v58 = vpop.f32.mrb[4].mxu0 }
 0x2f9   : > { %v1347_v59 = vpop.f32.mrb[5].mxu0 }
 0x2fe   : > { %v1033_v60 = vpop.f32.mrb[4].mxu1 }
 0x2ff   : > { %v1342_v63 = vpop.f32.mrb[5].mxu1  ;;  %v1178_v0 = vadd.f32 %v1177_v58, %v1033_v60 }
 0x301   : > { %v1189_v1 = vadd.f32 %v1185_v62, %v1178_v0 }
 0x302   : > { %v1106_v2 = vpop.f32.mrb[2].mxu1 }
 0x303   : > { %1192 = vst [vmem:[%s228_s29 + $0x10] sm:$0xff] %v1189_v1  ;;  %v1187_v3 = vadd.f32 %v1185_v62, %v1106_v2  ;;  %v1108_v4 = vpop.f32.mrb[3].mxu1 }
 0x304   : > { %v1188_v5 = vadd.f32 %v1185_v62, %v1108_v4 }
 0x305   : > { %1190 = vst [vmem:[%s228_s29] sm:$0xff] %v1187_v3 }
 0x306   : > { %1191 = vst [vmem:[%s228_s29 + $0x8] sm:$0xff] %v1188_v5 }
 0x307   : > { %1526 = shalt.err (!%p1523_p13)
}
 0x308   : > { %s1527_s5 = scalar_lea.hbm %s2020_s20, 384  ;;  %s1531_s14 = scalar_lea.hbm %s2068_s4, 768 }
 0x309   : > { %p1528_p7 = scmp.ne.s32.totalorder %s2020_s20, %s1527_s5  ;;  %p1532_p1 = scmp.lt.u32.totalorder %s2020_s20, %s2068_s4 }
 0x30a   : > { %p1533_p11 = scmp.lt.u32.totalorder %s1531_s14, %s1527_s5  ;;  %p1535_p9 = scmp.lt.u32.totalorder %s1527_s5, %s2020_s20 }
 0x30b   : > { %p1529_p3 = pnand %p1528_p7, %p2087_p10 }
 0x30c   : > { %p1534_p8 = por %p1533_p11, %p1532_p1 }
 0x30d   : > { %p1530_p12 = pneg %p1529_p3 }
 0x30e   : > { %p1536_p2 = por %p1535_p9, %p1534_p8 }
 0x310   : > { %p1537_p4 = pnand %p1536_p2, %p1530_p12 }
 0x312   : > { %1540 = shalt.err (!%p1537_p4)
}
 0x313   : > { %1382 = dma.vmem_to_hbm [thread:$0]  (%p2087_p10), %s2022_s26, 384, %s2020_s20, %s1194_s19  }
 0x314 PF: > { %s1220_s23 = sand.u32 1, %s1571_s15   ;;  %p2088_p5 = scmp.ne.s32.totalorder %s2077_s28, 0 }
 0x315   : > { %p2089_p0 = scmp.ge.s32.totalorder %s1583_s18, 2  ;;  %s1221_s25 = scalar_lea.sflag [#allocation5], %s1220_s23 }
 0x317   : > { %p1393_p6 = pnand %p2089_p0, %p2088_p5 }
 0x319   : > { %1566 = dma.done.wait (!%p1393_p6), %s1221_s25, 384  }
 0x31a   : > { %1568 = vsyncadd (!%p1393_p6), %s1221_s25, 4294966912  ;;  %p18_p13 = scmp.ge.s32.totalorder %s1651_s21, 4   ;;  %s2090_s15 = smov %s1575_s16 }
 0x31b   : > { %s2091_s16 = smov %s1579_s17  ;;  %s2092_s17 = smov %s1663_s24 }
 0x31c   : > { %s2093_s18 = smov %s1651_s21  ;;  %20 = sbr.rel (!%p18_p13) target bundleno = 6 (0x6), region = 87 }
 0x323   :  { %1226 = vsyncpa [#allocation4], 1 }
 0x324   :  { %1228 = vsyncpa [#allocation4 + $0x1], 1 }
 0x325   :  { %1229 = vsyncpa [#allocation7], 1 }
 0x326   :  { %1230 = vsyncpa [#allocation5], 1 }
 0x327   :  { %1232 = vsyncpa [#allocation5 + $0x1], 1 }

</bundles_post_ra>
